<compile_context>
chip_gen: v7x
topology: tpu7x:2x2x1
jax: 0.10.0
libtpu: 0.0.40
codegen_flags: <defaults>
</compile_context>

<pallas_src>
import jax
import jax.numpy as jnp
from jax.experimental import pallas as pl
from jax.experimental.pallas import tpu as pltpu


def _copy_kernel(x_ref, o_ref):
    # Pure pass-through on the current VMEM tile; DMA-bound stream.
    o_ref[...] = x_ref[...]


def _choose_lane_width(total_elems):
    """Largest lane-dense (multiple-of-128) width that divides the tensor."""
    for k in (4096, 2048, 1024, 512, 256, 128):
        if total_elems % k == 0:
            return k
    return None


def features_forward(x, *, use_pallas=True, target_tile_bytes=2 * 1024 * 1024):
    """Pallas equivalent of Features.forward (identity pass-through).

    Args:
      x: jnp.ndarray (e.g. NCHW feature map).
    Returns:
      jnp.ndarray, same shape/dtype/values as x.
    """
    if not use_pallas:
        # True identity contract: zero HBM traffic, zero launch overhead.
        return x

    orig_shape = x.shape
    total = x.size
    itemsize = jnp.dtype(x.dtype).itemsize

    k = _choose_lane_width(total)
    if k is None:
        # Total element count not a multiple of 128: fall back to a single
        # whole-array block (always legal since block == full array dims).
        last = orig_shape[-1] if x.ndim >= 2 else total
        x2d = x.reshape(total // last, last)
        out2d = pl.pallas_call(
            _copy_kernel,
            out_shape=jax.ShapeDtypeStruct(x2d.shape, x2d.dtype),
            input_output_aliases={0: 0},
        )(x2d)
        return out2d.reshape(orig_shape)

    rows = total // k
    x2d = x.reshape(rows, k)

    # Sublane packing: 8 rows/vreg for 4-byte, 16 for 2-byte, 32 for 1-byte.
    row_align = 8 * max(1, 4 // itemsize)

    # ~target_tile_bytes per buffer (double-buffered in + out stays well under
    # the 32 MiB scoped VMEM limit, and fits v7x's smaller 64 MiB VMEM).
    tile_rows = (target_tile_bytes // (k * itemsize)) // row_align * row_align
    tile_rows = max(row_align, tile_rows)
    if tile_rows >= rows:
        tile_rows = rows  # block equals full array extent on this dim: legal
        grid = (1,)
    else:
        grid = (pl.cdiv(rows, tile_rows),)  # tail block is clipped by Pallas

    out2d = pl.pallas_call(
        _copy_kernel,
        out_shape=jax.ShapeDtypeStruct((rows, k), x.dtype),
        grid=grid,
        in_specs=[pl.BlockSpec((tile_rows, k), lambda i: (i, 0))],
        out_specs=pl.BlockSpec((tile_rows, k), lambda i: (i, 0)),
        input_output_aliases={0: 0},
        compiler_params=pltpu.CompilerParams(
            dimension_semantics=("parallel",),  # shardable across v7x's 2 TCs
        ),
    )(x2d)

    return out2d.reshape(orig_shape)


class FeaturesPallas:
    """Mirror of the PyTorch `Features` module (abstract, no parameters)."""

    def __init__(self):
        self.feature_size = -1
        self.params = {}  # abstract base class: no trainable parameters
        self._forward = jax.jit(features_forward)

    def __call__(self, x):
        return self._forward(x)

    def param_groups(self, start_lr, feature_mult=1):
        # No parameters; mirror the PyTorch API shape.
        return [{"params": list(self.params.values()),
                 "lr": start_lr * feature_mult}]


if __name__ == "__main__":
    key = jax.random.PRNGKey(0)
    # Small NCHW input consistent with a feature-extractor forward.
    x = jax.random.normal(key, (2, 4, 16, 16), dtype=jnp.float32)

    model = FeaturesPallas()
    y = model(x)
    y = jax.block_until_ready(y)

    # Identity semantics check (the only well-defined behavior here).
    assert y.shape == x.shape and y.dtype == x.dtype
    assert bool(jnp.allclose(y, x))

    print("KERNEL_OK")
</pallas_src>

<mosaic_0001>
module attributes {stable_mosaic.version = 11 : i64} {
  func.func @_copy_kernel(%arg0: i32, %arg1: memref<1x2048xf32, #tpu.memory_space<vmem>>, %arg2: memref<1x2048xf32, #tpu.memory_space<vmem>>) attributes {dimension_semantics = [#tpu.dimension_semantics<parallel>], iteration_bounds = array<i64: 1>, scalar_prefetch = 0 : i64, scratch_operands = 0 : i64, tpu.core_type = #tpu.core_type<tc>, window_params = [{transform_indices = @transform_0, window_bounds = array<i64: 1, 2048>}, {transform_indices = @transform_1, window_bounds = array<i64: 1, 2048>}]} {
    %c0 = arith.constant 0 : index
    %c0_0 = arith.constant 0 : index
    %0 = vector.load %arg1[%c0, %c0_0] : memref<1x2048xf32, #tpu.memory_space<vmem>>, vector<1x2048xf32>
    %c0_1 = arith.constant 0 : index
    %c0_2 = arith.constant 0 : index
    %1 = vector.load %arg2[%c0_1, %c0_2] : memref<1x2048xf32, #tpu.memory_space<vmem>>, vector<1x2048xf32>
    tpu.vector_store %arg2[%c0_1, %c0_2], %0 {strides = array<i32>} : memref<1x2048xf32, #tpu.memory_space<vmem>>, vector<1x2048xf32>,
    return
  }
  func.func @transform_0(%arg0: i32) -> (i32, i32) {
    %c0_i32 = arith.constant 0 : i32
    %c0_i32_0 = arith.constant 0 : i32
    return %arg0, %c0_i32 : i32, i32
  }
  func.func @transform_1(%arg0: i32) -> (i32, i32) {
    %c0_i32 = arith.constant 0 : i32
    %c0_i32_0 = arith.constant 0 : i32
    return %arg0, %c0_i32 : i32, i32
  }
}

</mosaic_0001>

<bundles_post_ra>
// kernel: features_forward.1
= control target key start
LH: loop header
LB: loop body
LE: loop exit
PB: predicated region body
PF: predicated region fallthrough
CT: control target
= control target key end

     0   :  { %s38_s0 = inlined_call_operand.vmem [shape: f32[1,2048], index: 0, kind: input, shape index: {}, may-alias: {0,1}]   ;;  %s39_s1 = inlined_call_operand.vmem [shape: f32[1,2048], index: 1, kind: output, shape index: {}, may-alias: {0,1}]  }
   0x1   :  { %v8_v0 = vld [vmem:[%s38_s0] sm:$0xff]  ;;  %v9_v1 = vld [vmem:[%s38_s0 + $0x8] sm:$0xff] }
   0x2   :  { %10 = vst [vmem:[%s39_s1] sm:$0xff] %v8_v0  ;;  %11 = vst [vmem:[%s39_s1 + $0x8] sm:$0xff] %v9_v1 }

</bundles_post_ra>
